<compile_context>
chip_gen: v5e
topology: v5e:2x2
jax: 0.10.0
libtpu: 0.0.40
codegen_flags: <defaults>
</compile_context>

<pallas_src>
import functools
import math

import numpy as np

import jax
import jax.numpy as jnp
from jax.experimental import pallas as pl
from jax.experimental.pallas import tpu as pltpu


# ----------------------------------------------------------------------------
# Pallas kernel: build mask from factorized keep vectors and multiply.
# ----------------------------------------------------------------------------
def _gridmask_kernel(rowm_ref, colm_ref, x_ref, o_ref, *, mode):
    # rowm_ref: (1, 1, TH, 1)  per-row keep values (0/1) in x.dtype
    # colm_ref: (1, 1, 1, W)   per-col keep values (0/1) in x.dtype
    # x_ref/o_ref: (1, TC, TH, W)
    keep = rowm_ref[...] * colm_ref[...]            # (1, 1, TH, W) broadcast-AND
    mask = (1.0 - keep) if mode == 1 else keep      # static (compile-time) branch
    o_ref[...] = x_ref[...] * mask                  # broadcasts over channel dim


# ----------------------------------------------------------------------------
# Host-side tiling / VMEM helpers
# ----------------------------------------------------------------------------
def _sublane_multiple(dtype):
    return max(8, 32 // jnp.dtype(dtype).itemsize)   # f32: 8, bf16: 16, int8: 32


def _pick_tiles(c, h, w, dtype, target_bytes=4 << 20):
    """Pick (TC, TH) for a (1, TC, TH, W) block whose VMEM-padded size is as
    close to (but not above) target_bytes as possible.  TH must be a multiple
    of the dtype's sublane multiple or equal H; TC only needs to divide C."""
    itemsize = jnp.dtype(dtype).itemsize
    sub = _sublane_multiple(dtype)
    w_pad = -(-w // 128) * 128                       # lanes pad to 128 in VMEM
    row_bytes = w_pad * itemsize

    th_cands = [t for t in range(sub, h + 1, sub) if h % t == 0]
    if h not in th_cands:
        th_cands.append(h)                           # full extent always legal
    tc_cands = [t for t in range(1, c + 1) if c % t == 0]

    options = []
    for tc in tc_cands:
        for th in th_cands:
            th_pad = -(-th // sub) * sub
            options.append((tc * th_pad * row_bytes, tc, th))
    fitting = [o for o in options if o[0] <= target_bytes]
    _, tc, th = max(fitting) if fitting else min(options)
    return tc, th


def _vmem_limit_bytes(tc, th, w, dtype):
    """Scoped-VMEM limit: double-buffered in + out blocks plus the two padded
    keep-vector blocks, with headroom.  (Capped well under v7x's 64 MiB.)"""
    itemsize = jnp.dtype(dtype).itemsize
    sub = _sublane_multiple(dtype)
    th_pad = -(-th // sub) * sub
    w_pad = -(-w // 128) * 128
    x_blk = tc * th_pad * w_pad * itemsize           # one padded x/out block
    row_blk = th_pad * 128 * itemsize                # (1,1,TH,1) -> (TH_pad, 128)
    col_blk = sub * w_pad * itemsize                 # (1,1,1,W)  -> (sub, W_pad)
    needed = 2 * (2 * x_blk + row_blk + col_blk)     # 2x in + 2x out + 2x each vec
    return int(min(max(needed + (8 << 20), 16 << 20), 48 << 20))


# ----------------------------------------------------------------------------
# Forward wrapper
# ----------------------------------------------------------------------------
def gridmask_forward(x, rowm, colm, *, mode=0, donate_x=False,
                     core_parallel_batch=False, target_bytes=4 << 20):
    """x: (N, C, H, W); rowm: (N, 1, H, 1); colm: (N, 1, 1, W), both x.dtype."""
    N, C, H, W = x.shape
    assert rowm.shape == (N, 1, H, 1) and colm.shape == (N, 1, 1, W)

    tc, th = _pick_tiles(C, H, W, x.dtype, target_bytes)
    n_h, n_c = H // th, C // tc

    # v7x has 2 TensorCores: optionally force the batch axis across cores.
    # Default stays plain PARALLEL for portability to single-TC v5e/v6e.
    sem0 = pltpu.CORE_PARALLEL if core_parallel_batch else pltpu.PARALLEL
    dim_sems = (sem0, pltpu.PARALLEL, pltpu.PARALLEL)

    extra = {}
    if donate_x:
        # inputs are (rowm, colm, x): x is operand 2; alias it to output 0.
        extra["input_output_aliases"] = {2: 0}

    return pl.pallas_call(
        functools.partial(_gridmask_kernel, mode=mode),
        out_shape=jax.ShapeDtypeStruct((N, C, H, W), x.dtype),
        grid=(N, n_h, n_c),
        in_specs=[
            # Keep-vector blocks are independent of the (innermost) C axis, so
            # they stay resident across channel tiles.
            pl.BlockSpec((1, 1, th, 1), lambda n, h, c: (n, 0, h, 0)),
            pl.BlockSpec((1, 1, 1, W), lambda n, h, c: (n, 0, 0, 0)),
            pl.BlockSpec((1, tc, th, W), lambda n, h, c: (n, c, h, 0)),
        ],
        out_specs=pl.BlockSpec((1, tc, th, W), lambda n, h, c: (n, c, h, 0)),
        compiler_params=pltpu.CompilerParams(
            dimension_semantics=dim_sems,
            vmem_limit_bytes=_vmem_limit_bytes(tc, th, W, x.dtype),
        ),
        **extra,
    )(rowm, colm, x)


# ----------------------------------------------------------------------------
# Glue: per-sample RNG parameters and factorized keep-vector construction.
# ----------------------------------------------------------------------------
def sample_gridmask_params(key, n, d1, d2, ratio=0.5, prob=1.0):
    assert d1 >= 1 and d2 > d1, "need d >= 1 (mod-by-zero otherwise)"
    k_d, k_h, k_w, k_p = jax.random.split(key, 4)
    d = jax.random.randint(k_d, (n,), d1, d2, dtype=jnp.int32)
    l = jnp.ceil(d.astype(jnp.float32) * ratio).astype(jnp.int32)
    st_h = jax.random.randint(k_h, (n,), 0, d, dtype=jnp.int32)
    st_w = jax.random.randint(k_w, (n,), 0, d, dtype=jnp.int32)
    apply_flag = (jax.random.uniform(k_p, (n,)) <= prob).astype(jnp.int32)
    return d, l, st_h, st_w, apply_flag


def build_gridmask_keep_vectors(d, l, st_h, st_w, apply_flag, h, w, mode=0,
                                dtype=jnp.float32):
    """Factorized keep vectors (N,1,H,1) and (N,1,1,W), values in {0, 1}.

    The kernel applies mask = rowm*colm (mode 0) or 1 - rowm*colm (mode 1).
    Skipped samples (apply_flag == 0) are encoded so the effective mask is 1.
    """
    n = d.shape[0]
    hh = math.ceil(math.sqrt(h * h + w * w))
    off_h = (hh - h) // 2
    off_w = (hh - w) // 2
    rows = jnp.arange(h, dtype=jnp.int32) + off_h                     # (H,)
    cols = jnp.arange(w, dtype=jnp.int32) + off_w                     # (W,)
    row_keep = jnp.mod(rows[None, :] - st_h[:, None], d[:, None]) >= l[:, None]
    col_keep = jnp.mod(cols[None, :] - st_w[:, None], d[:, None]) >= l[:, None]
    apply_b = apply_flag.astype(bool)[:, None]
    if mode == 1:
        # kernel mask = 1 - rowm*colm; force the product to 0 for skipped rows.
        row_keep = jnp.where(apply_b, row_keep, False)
    else:
        # kernel mask = rowm*colm; force both factors to 1 for skipped samples.
        row_keep = jnp.where(apply_b, row_keep, True)
        col_keep = jnp.where(apply_b, col_keep, True)
    rowm = row_keep.astype(dtype).reshape(n, 1, h, 1)
    colm = col_keep.astype(dtype).reshape(n, 1, 1, w)
    return rowm, colm


# ----------------------------------------------------------------------------
# Reference mirroring the PyTorch band-slicing loops (rotate=1 path).
# ----------------------------------------------------------------------------
def gridmask_reference(x, d, l, st_h, st_w, apply_flag, mode=0):
    x = np.asarray(x)
    N, C, H, W = x.shape
    hh = math.ceil(math.sqrt(H * H + W * W))
    out = np.empty_like(x)
    for i in range(N):
        if int(apply_flag[i]) == 0:
            out[i] = x[i]
            continue
        di, li, sh, sw = int(d[i]), int(l[i]), int(st_h[i]), int(st_w[i])
        mask = np.ones((hh, hh), np.float32)
        for k in range(-1, hh // di + 1):
            s = di * k + sh
            t = s + li
            s = max(min(s, hh), 0)
            t = max(min(t, hh), 0)
            mask[s:t, :] *= 0
        for k in range(-1, hh // di + 1):
            s = di * k + sw
            t = s + li
            s = max(min(s, hh), 0)
            t = max(min(t, hh), 0)
            mask[:, s:t] *= 0
        mask = mask[(hh - H) // 2:(hh - H) // 2 + H,
                    (hh - W) // 2:(hh - W) // 2 + W]
        if mode == 1:
            mask = 1.0 - mask
        out[i] = x[i] * mask[None, :, :]
    return out


if __name__ == "__main__":
    def run_case(key, N, C, H, W, d1, d2, ratio, mode, prob,
                 apply_override=None, donate=False):
        k_x, k_p = jax.random.split(key)
        x = jax.random.normal(k_x, (N, C, H, W), dtype=jnp.float32)
        d, l, st_h, st_w, apply_flag = sample_gridmask_params(
            k_p, N, d1, d2, ratio, prob)
        if apply_override is not None:
            apply_flag = jnp.asarray(apply_override, dtype=jnp.int32)
        rowm, colm = build_gridmask_keep_vectors(
            d, l, st_h, st_w, apply_flag, H, W, mode=mode, dtype=x.dtype)
        x_np = np.asarray(x)   # snapshot before any (possibly donated) call
        out = gridmask_forward(x, rowm, colm, mode=mode, donate_x=donate)
        out = jax.block_until_ready(out)
        ref = gridmask_reference(x_np, np.asarray(d), np.asarray(l),
                                 np.asarray(st_h), np.asarray(st_w),
                                 np.asarray(apply_flag), mode=mode)
        assert out.shape == (N, C, H, W)
        assert np.allclose(np.asarray(out), ref, atol=1e-6), "mismatch vs reference"

    key = jax.random.PRNGKey(0)
    k1, k2, k3 = jax.random.split(key, 3)

    # GridMask(d1=2, d2=8, rotate=1, ratio=0.5, mode=0, prob=1.0) on (2,4,16,16).
    run_case(k1, 2, 4, 16, 16, 2, 8, 0.5, mode=0, prob=1.0)
    # mode=1, explicit skipped sample, and crop offsets larger than d (H=24,W=32).
    run_case(k2, 2, 3, 24, 32, 2, 8, 0.5, mode=1, prob=1.0, apply_override=[1, 0])
    # donate_x (input_output_aliases={2: 0}) path against the same reference.
    run_case(k3, 2, 4, 16, 16, 2, 8, 0.5, mode=0, prob=1.0, donate=True)

    print("KERNEL_OK")
</pallas_src>

<mosaic_0001>
module attributes {stable_mosaic.version = 11 : i64} {
  func.func @_gridmask_kernel(%arg0: i32, %arg1: i32, %arg2: i32, %arg3: memref<1x1x16x1xf32, #tpu.memory_space<vmem>>, %arg4: memref<1x1x1x16xf32, #tpu.memory_space<vmem>>, %arg5: memref<1x4x16x16xf32, #tpu.memory_space<vmem>>, %arg6: memref<1x4x16x16xf32, #tpu.memory_space<vmem>>) attributes {dimension_semantics = [#tpu.dimension_semantics<parallel>, #tpu.dimension_semantics<parallel>, #tpu.dimension_semantics<parallel>], iteration_bounds = array<i64: 2, 1, 1>, scalar_prefetch = 0 : i64, scratch_operands = 0 : i64, tpu.core_type = #tpu.core_type<tc>, window_params = [{transform_indices = @transform_0, window_bounds = array<i64: 1, 1, 16, 1>}, {transform_indices = @transform_1, window_bounds = array<i64: 1, 1, 1, 16>}, {transform_indices = @transform_2, window_bounds = array<i64: 1, 4, 16, 16>}, {transform_indices = @transform_3, window_bounds = array<i64: 1, 4, 16, 16>}]} {
    %c0 = arith.constant 0 : index
    %c0_0 = arith.constant 0 : index
    %c0_1 = arith.constant 0 : index
    %c0_2 = arith.constant 0 : index
    %0 = vector.load %arg3[%c0, %c0_0, %c0_1, %c0_2] : memref<1x1x16x1xf32, #tpu.memory_space<vmem>>, vector<1x1x16x1xf32>
    %c0_3 = arith.constant 0 : index
    %c0_4 = arith.constant 0 : index
    %c0_5 = arith.constant 0 : index
    %c0_6 = arith.constant 0 : index
    %1 = vector.load %arg4[%c0_3, %c0_4, %c0_5, %c0_6] : memref<1x1x1x16xf32, #tpu.memory_space<vmem>>, vector<1x1x1x16xf32>
    %2 = vector.broadcast %0 : vector<1x1x16x1xf32> to vector<1x1x16x16xf32>
    %3 = vector.broadcast %1 : vector<1x1x1x16xf32> to vector<1x1x16x16xf32>
    %4 = arith.mulf %2, %3 : vector<1x1x16x16xf32>
    %c0_7 = arith.constant 0 : index
    %c0_8 = arith.constant 0 : index
    %c0_9 = arith.constant 0 : index
    %c0_10 = arith.constant 0 : index
    %5 = vector.load %arg5[%c0_7, %c0_8, %c0_9, %c0_10] : memref<1x4x16x16xf32, #tpu.memory_space<vmem>>, vector<1x4x16x16xf32>
    %6 = vector.broadcast %4 : vector<1x1x16x16xf32> to vector<1x4x16x16xf32>
    %7 = arith.mulf %5, %6 : vector<1x4x16x16xf32>
    %c0_11 = arith.constant 0 : index
    %c0_12 = arith.constant 0 : index
    %c0_13 = arith.constant 0 : index
    %c0_14 = arith.constant 0 : index
    %8 = vector.load %arg6[%c0_11, %c0_12, %c0_13, %c0_14] : memref<1x4x16x16xf32, #tpu.memory_space<vmem>>, vector<1x4x16x16xf32>
    tpu.vector_store %arg6[%c0_11, %c0_12, %c0_13, %c0_14], %7 {strides = array<i32>} : memref<1x4x16x16xf32, #tpu.memory_space<vmem>>, vector<1x4x16x16xf32>,
    return
  }
  func.func @transform_0(%arg0: i32, %arg1: i32, %arg2: i32) -> (i32, i32, i32, i32) {
    %c0_i32 = arith.constant 0 : i32
    %c0_i32_0 = arith.constant 0 : i32
    %c0_i32_1 = arith.constant 0 : i32
    return %arg0, %c0_i32, %arg1, %c0_i32_0 : i32, i32, i32, i32
  }
  func.func @transform_1(%arg0: i32, %arg1: i32, %arg2: i32) -> (i32, i32, i32, i32) {
    %c0_i32 = arith.constant 0 : i32
    %c0_i32_0 = arith.constant 0 : i32
    %c0_i32_1 = arith.constant 0 : i32
    %c0_i32_2 = arith.constant 0 : i32
    return %arg0, %c0_i32, %c0_i32_0, %c0_i32_1 : i32, i32, i32, i32
  }
  func.func @transform_2(%arg0: i32, %arg1: i32, %arg2: i32) -> (i32, i32, i32, i32) {
    %c0_i32 = arith.constant 0 : i32
    %c0_i32_0 = arith.constant 0 : i32
    return %arg0, %arg2, %arg1, %c0_i32 : i32, i32, i32, i32
  }
  func.func @transform_3(%arg0: i32, %arg1: i32, %arg2: i32) -> (i32, i32, i32, i32) {
    %c0_i32 = arith.constant 0 : i32
    %c0_i32_0 = arith.constant 0 : i32
    return %arg0, %arg2, %arg1, %c0_i32 : i32, i32, i32, i32
  }
}

</mosaic_0001>

<bundles_post_ra>
// kernel: tpu_custom_call.1
= control target key start
LH: loop header
LB: loop body
LE: loop exit
PB: predicated region body
PF: predicated region fallthrough
CT: control target
= control target key end

     0   :  { %8 = vsyncpa [#allocation3], 0  ;;  %s836_s0 = inlined_call_operand.vmem [shape: f32[2,1,16,1], index: 0, kind: input, shape index: {}]   ;;  %s837_s1 = inlined_call_operand.vmem [shape: f32[2,1,1,16], index: 1, kind: input, shape index: {}]   ;;  %s838_s2 = inlined_call_operand.hbm [shape: f32[2,4,16,16], index: 2, kind: input, shape index: {}]   ;;  %s839_s3 = inlined_call_operand.hbm [shape: f32[2,4,16,16], index: 3, kind: output, shape index: {}]  }
   0x1   :  { %10 = vsyncpa [#allocation3 + $0x1], 0 }
   0x2   :  { %11 = vsyncpa [#allocation4], 0 }
   0x3   :  { %13 = vsyncpa [#allocation4 + $0x1], 0  ;;  %s690_s12 = smov 0   ;;  %s692_s13 = smov 0  }
   0x4   :  { %s694_s14 = smov 0   ;;  %s696_s15 = smov 0  }
   0x5   :  { %s698_s16 = smov 0   ;;  %s700_s17 = smov 0  }
   0x6 LB: > { %s462_s18 = sadd.s32 4294967295, %s663_s17   ;;  %s463_s19 = sadd.s32 4294967294, %s663_s17   ;;  %s663_s17 = sphi %s700_s17, %s19_s17   ;;  %s659_s16 = sphi %s698_s16, %s848_s16   ;;  %s655_s15 = sphi %s696_s15, %s847_s15   ;;  %s651_s14 = sphi %s694_s14, %s846_s14   ;;  %s647_s13 = sphi %s692_s13, %s845_s13   ;;  %s643_s12 = sphi %s690_s12, %s844_s12  }
   0x7   : > { %s38_s20 = sadd.s32 1, %s659_s16  ;;  %s103_s21 = sadd.s32 1, %s651_s14 }
   0x8   : > { %p40_p0 = scmp.ge.s32.totalorder %s38_s20, 2  ;;  %p110_p1 = scmp.ne.s32.totalorder %s651_s14, %s647_s13 }
   0x9   : > { %p111_p2 = scmp.eq.s32.totalorder %s663_s17, 0  ;;  %p116_p3 = scmp.ne.s32.totalorder %s647_s13, %s643_s12 }
   0xa   : > { %s850_s20 = smov (%p40_p0, %s38_s20), 0  ;;  %p117_p5 = scmp.eq.s32.totalorder %s462_s18, 0 }
   0xb   : > { %p731_p4 = por %p111_p2, %p110_p1  ;;  %s96_s23 = ssub.s32 %s659_s16, %s850_s20 }
   0xc   : > { %p144_p6 = scmp.eq.s32.totalorder %s462_s18, 1  ;;  %p101_p7 = scmp.eq.s32.totalorder %s96_s23, 0 }
   0xd   : > { %p737_p8 = por %p117_p5, %p116_p3  ;;  %p150_p10 = scmp.eq.s32.totalorder %s463_s19, 1 }
   0xe   : > { %p741_p9 = por %p144_p6, %p110_p1  ;;  %p465_p12 = scmp.ge.s32.totalorder %s663_s17, 2 }
   0xf   : > { %s746_s26 = scalar_select %p101_p7, %s651_s14, %s103_s21  }
  0x10   : > { %p748_p11 = por %p150_p10, %p116_p3  ;;  %p494_p13 = scmp.lt.s32.totalorder %s663_s17, 2 }
  0x11   : > { %s189_s28 = sand.u32 1, %s651_s14   ;;  %s479_s30 = sshll.u32 %s659_s16, 6 }
  0x12   : > { %s466_s29 = sshll.u32 %s189_s28, 6  ;;  %s203_s6 = scalar_lea.hbm %s838_s2, %s479_s30 }
  0x13   : > { %s193_s7 = scalar_lea.vmem [#allocation2], %s466_s29  ;;  %s204_s9 = sshll.u32 %s203_s6, 4  ;;  %s205_s9 = int_to_ptr.hbm [resolvable:$true] %s204_s9 }
  0x14   : > { %s206_s8 = sshll.u32 %s193_s7, 4  ;;  %p487_p0 = pnand %p494_p13, %p731_p4  ;;  %s207_s8 = int_to_ptr.vmem [resolvable:$true] %s206_s8 }
  0x15   : > { %p469_p1 = scmp.ge.s32.totalorder %s663_s17, 1  ;;  %s190_s10 = scalar_lea.sflag [#allocation3], %s189_s28 }
  0x16   : > { %s665_s11 = smov 128   ;;  %s666_s18 = smov 8  }
  0x17   : > { %489 = dma.hbm_to_vmem [thread:$0]  (!%p487_p0), %s205_s9, 1024, %s207_s8, %s190_s10, %s665_s11, %s665_s11, %s666_s18  }
  0x18   : > { %p214_p2 = scmp.lt.s32.totalorder %s663_s17, 3 }
  0x1a   : > { %p215_p3 = pnand %p469_p1, %p214_p2 }
  0x1b   : > { %s764_s19 = sand.u32 (!%p215_p3), 1, %s647_s13  }
  0x1c   : > { %218 = sbr.rel (%p215_p3) target bundleno = 175 (0xaf), region = 32  ;;  %s470_s21 = sshll.u32 (!%p215_p3), %s764_s19, 6 }
  0x1d   : > { %s221_s23 = scalar_lea.sflag (!%p215_p3), [#allocation3], %s764_s19  ;;  %s768_s29 = scalar_lea.vmem (!%p215_p3), [#allocation2], %s470_s21 }
  0x21   : > { %634 = dma.done.wait (%p737_p8), %s221_s23, 1024  }
  0x22   : > { %636 = vsyncadd (%p737_p8), %s221_s23, 4294966272  ;;  %p261_p4 = scmp.lt.s32.totalorder %s655_s15, 1  ;;  %v667_v0 = vmov 0   ;;  %v295_v4 = vld [vmem:[%s768_s29] sm:$0xff]  ;;  %v297_v5 = vld [vmem:[%s768_s29 + $0x10] sm:$0xff]  ;;  %vm311_vm0 = vcmask 130048  }
  0x23   : > { %549 = vset.pattern.permute.xlu0 %v667_v0  ;;  %v299_v6 = vld [vmem:[%s768_s29 + $0x20] sm:$0xff]  ;;  %v301_v8 = vld [vmem:[%s768_s29 + $0x30] sm:$0xff]  ;;  %s481_s8 = sshll.u32 %s655_s15, 6  ;;  %s259_s9 = scalar_lea.vmem [#allocation5], %s470_s21  ;;  %v296_v14 = vld [vmem:[%s768_s29 + $0x8] sm:$0xff] }
  0x24   : > { %s262_s22 = scalar_select %p261_p4, %s655_s15, 1  ;;  %v298_v15 = vld [vmem:[%s768_s29 + $0x18] sm:$0xff]  ;;  %v300_v16 = vld [vmem:[%s768_s29 + $0x28] sm:$0xff] }
  0x25   : > { %s337_s18 = scalar_lea.hbm %s839_s3, %s481_s8  ;;  %v302_v18 = vld [vmem:[%s768_s29 + $0x38] sm:$0xff]  ;;  %s338_s15 = sshll.u32 %s259_s9, 4  ;;  %s339_s15 = int_to_ptr.vmem [resolvable:$true] %s338_s15 }
  0x26   : > { %s480_s28 = sshll.u32 %s262_s22, 4  ;;  %s272_s24 = scalar_lea.vmem %s837_s1, %s262_s22 }
  0x27   : > { %s268_s5 = scalar_lea.vmem %s836_s0, %s480_s28  ;;  %v550_v3 = vld [vmem:[%s272_s24] ss:$0 sm:$0xff]  ;;  %s340_s21 = sshll.u32 %s337_s18, 4  ;;  %s341_s21 = int_to_ptr.hbm [resolvable:$true] %s340_s21 }
  0x28   : > { %v277_v1 = vld [vmem:[%s268_s5] sm:$0xff]  ;;  %v278_v2 = vld [vmem:[%s268_s5 + $0x8] sm:$0xff]  ;;  %s321_s23 = scalar_lea.sflag [#allocation4], %s764_s19  ;;  %s595_s29 = sshra.s32 %s341_s21, 4  ;;  %s596_s29 = int_to_ptr.hbm [resolvable:$true] %s595_s29 }
  0x29   : > { %282 = vperm.xlu0 %549, %v277_v1   ;;  %s597_s22 = scalar_lea.hbm %s596_s29, 64  ;;  %s601_s4 = scalar_lea.hbm %s839_s3, 128 }
  0x2a   : > { %p598_p5 = scmp.ne.s32.totalorder %s596_s29, %s597_s22  ;;  %p602_p8 = scmp.lt.s32.totalorder %s596_s29, %s839_s3 }
  0x2b   : > { %p603_p10 = scmp.lt.s32.totalorder %s601_s4, %s597_s22 }
  0x2c   : > { %p599_p6 = pnand %p598_p5, %p741_p9 }
  0x2d   : > { %p604_p13 = por %p603_p10, %p602_p8 }
  0x2e   : > { %p600_p7 = pneg %p599_p6 }
  0x30   : > { %p605_p0 = pnand %p604_p13, %p600_p7 }
  0x31   : > { %287 = vperm.xlu0 %549, %v278_v2  }
  0x9b   : > { %v283_v7 = vpop.permute.xlu0 %282 }
  0x9c   : > { %v293_v9 = vmul.f32 %v550_v3, %v283_v7 }
  0x9e   : > { %v303_v10 = vmul.f32 %v295_v4, %v293_v9  ;;  %v305_v11 = vmul.f32 %v297_v5, %v293_v9  ;;  %v307_v12 = vmul.f32 %v299_v6, %v293_v9  ;;  %v309_v13 = vmul.f32 %v301_v8, %v293_v9 }
  0xa0   : > { %312 = vst.msk [vmem:[%s259_s9] sm:$0xff] %vm311_vm0, %v303_v10 }
  0xa1   : > { %314 = vst.msk [vmem:[%s259_s9 + $0x10] sm:$0xff] %vm311_vm0, %v305_v11 }
  0xa2   : > { %316 = vst.msk [vmem:[%s259_s9 + $0x20] sm:$0xff] %vm311_vm0, %v307_v12 }
  0xa3   : > { %318 = vst.msk [vmem:[%s259_s9 + $0x30] sm:$0xff] %vm311_vm0, %v309_v13  ;;  %v288_v17 = vpop.permute.xlu0 %287 }
  0xa4   : > { %v294_v19 = vmul.f32 %v550_v3, %v288_v17 }
  0xa6   : > { %v304_v20 = vmul.f32 %v296_v14, %v294_v19  ;;  %v306_v21 = vmul.f32 %v298_v15, %v294_v19  ;;  %v308_v22 = vmul.f32 %v300_v16, %v294_v19  ;;  %v310_v23 = vmul.f32 %v302_v18, %v294_v19 }
  0xa8   : > { %313 = vst.msk [vmem:[%s259_s9 + $0x8] sm:$0xff] %vm311_vm0, %v304_v20 }
  0xa9   : > { %315 = vst.msk [vmem:[%s259_s9 + $0x18] sm:$0xff] %vm311_vm0, %v306_v21 }
  0xaa   : > { %317 = vst.msk [vmem:[%s259_s9 + $0x28] sm:$0xff] %vm311_vm0, %v308_v22 }
  0xab   : > { %319 = vst.msk [vmem:[%s259_s9 + $0x38] sm:$0xff] %vm311_vm0, %v310_v23 }
  0xac   : > { %608 = shalt.err (!%p605_p0)
}
  0xad   : > { %s668_s19 = smov 128   ;;  %s669_s7 = smov 8  }
  0xae   : > { %484 = dma.vmem_to_hbm [thread:$0]  (%p741_p9), %s339_s15, 1024, %s341_s21, %s321_s23, %s668_s19, %s668_s19, %s669_s7  }
  0xaf PF: > { %s355_s24 = sand.u32 1, %s643_s12   ;;  %p491_p1 = pnand %p465_p12, %p748_p11 }
  0xb0   : > { %s356_s8 = scalar_lea.sflag [#allocation4], %s355_s24 }
  0xb1   : > { %p492_p2 = pneg %p491_p1 }
  0xb3   : > { %638 = dma.done.wait (%p492_p2), %s356_s8, 1024  }
  0xb4   : > { %640 = vsyncadd (%p492_p2), %s356_s8, 4294966272  ;;  %s19_s17 = sadd.s32 1, %s663_s17   ;;  %s844_s12 = smov %s647_s13 }
  0xb5   : > { %p16_p3 = scmp.ge.s32.totalorder %s19_s17, 4   ;;  %s845_s13 = smov %s651_s14 }
  0xb6   : > { %s846_s14 = smov %s746_s26  ;;  %s847_s15 = smov %s659_s16 }
  0xb7   : > { %s848_s16 = smov %s850_s20  ;;  %18 = sbr.rel (!%p16_p3) target bundleno = 6 (0x6), region = 83 }
  0xbc   :  { %362 = vsyncpa [#allocation3], 1 }
  0xbd   :  { %364 = vsyncpa [#allocation3 + $0x1], 1 }
  0xbe   :  { %365 = vsyncpa [#allocation4], 1 }
  0xbf   :  { %367 = vsyncpa [#allocation4 + $0x1], 1 }

</bundles_post_ra>
